<compile_context>
chip_gen: v5e
topology: v5e:2x2
jax: 0.10.0
libtpu: 0.0.40
codegen_flags: <defaults>
</compile_context>

<pallas_src>
import functools

import jax
import jax.numpy as jnp
from jax import lax
from jax.experimental import pallas as pl
from jax.experimental.pallas import tpu as pltpu

_BN_EPS = 1e-5   # PyTorch BatchNorm1d default
_LANE = 128
_SUBLANE = 8


def _ceil_to(x, m):
    return (x + m - 1) // m * m


def _pick_feature_tile(d_out_pad, max_tile=512):
    """Largest multiple of 128 (<= max_tile) that divides d_out_pad."""
    t = min(max_tile, d_out_pad)
    while t > _LANE and d_out_pad % t != 0:
        t -= _LANE
    return t


def _nonlin_block_kernel(x_ref, w_ref, b_ref, g_ref, be_ref, o_ref, *,
                         do_batchnorm, n_valid):
    x = x_ref[...]                      # [tile_n, d_in_pad]  (f32 or bf16)
    w = w_ref[...]                      # [tile_f, d_in_pad]  (same dtype)
    # Contract both operands on their last (d_in) axis: works directly on the
    # PyTorch [d_out, d_in] weight layout, no transpose anywhere.
    y = lax.dot_general(x, w, (((1,), (1,)), ((), ())),
                        preferred_element_type=jnp.float32)  # [tile_n, tile_f]
    y = y + b_ref[...]

    if do_batchnorm:
        # BatchNorm1d training-mode: per-feature batch mean / biased variance.
        # Padded batch rows are masked out of the statistics; stats are exact
        # because the whole batch is in this block (only features are tiled).
        n_pad = y.shape[0]
        row = lax.broadcasted_iota(jnp.int32, (n_pad, 1), 0)
        valid = (row < n_valid).astype(jnp.float32)          # [n_pad, 1]
        inv_n = jnp.float32(1.0 / n_valid)
        mean = jnp.sum(y * valid, axis=0, keepdims=True) * inv_n
        centered = (y - mean) * valid
        var = jnp.sum(centered * centered, axis=0, keepdims=True) * inv_n
        y = (y - mean) * lax.rsqrt(var + _BN_EPS)
        y = y * g_ref[...] + be_ref[...]

    o_ref[...] = jnp.maximum(y, 0.0).astype(o_ref.dtype)


def nonlin_block(x, weight, bias, gamma=None, beta=None, *, batchnorm=True,
                 matmul_dtype=jnp.float32, max_feature_tile=512,
                 max_batch_tile=256):
    """Forward pass of NonlinBlock.

    x:      [N, d_in] float32
    weight: [d_out, d_in]   (PyTorch nn.Linear layout, NOT transposed)
    bias:   [d_out]
    gamma:  [d_out] or None (BatchNorm1d weight)
    beta:   [d_out] or None (BatchNorm1d bias)
    """
    n, d_in = x.shape
    d_out, d_in_w = weight.shape
    assert d_in_w == d_in, "weight/x d_in mismatch"

    d_in_pad = _ceil_to(d_in, _LANE)
    d_out_pad = _ceil_to(d_out, _LANE)
    tile_f = _pick_feature_tile(d_out_pad, max_feature_tile)

    if batchnorm:
        # Batch statistics couple all rows -> full batch per block, tile only
        # over features.
        # TODO(synk): for batches too large to keep resident in VMEM, switch to
        # a two-pass sum / sum-of-squares reduction over an "arbitrary" N axis.
        n_pad = _ceil_to(n, _SUBLANE)
        tile_n = n_pad
    else:
        n_pad = _ceil_to(n, _SUBLANE)
        tile_n = min(_ceil_to(max_batch_tile, _SUBLANE), n_pad)
        n_pad = _ceil_to(n_pad, tile_n)

    f32 = jnp.float32
    # Zero-pad to lane/sublane-dense shapes. Zero columns are inert in the
    # matmul; padded rows are masked out of the BN statistics and sliced off.
    x_p = jnp.zeros((n_pad, d_in_pad), f32).at[:n, :d_in].set(x.astype(f32))
    w_p = jnp.zeros((d_out_pad, d_in_pad), f32).at[:d_out, :d_in].set(
        weight.astype(f32))
    x_p = x_p.astype(matmul_dtype)
    w_p = w_p.astype(matmul_dtype)

    b_p = jnp.zeros((1, d_out_pad), f32).at[0, :d_out].set(bias.astype(f32))
    g_src = jnp.ones((d_out,), f32) if gamma is None else gamma.astype(f32)
    be_src = jnp.zeros((d_out,), f32) if beta is None else beta.astype(f32)
    g_p = jnp.zeros((1, d_out_pad), f32).at[0, :d_out].set(g_src)
    be_p = jnp.zeros((1, d_out_pad), f32).at[0, :d_out].set(be_src)

    kernel = functools.partial(_nonlin_block_kernel,
                               do_batchnorm=batchnorm, n_valid=n)

    n_tiles = n_pad // tile_n
    f_tiles = d_out_pad // tile_f

    if batchnorm:
        grid = (f_tiles,)
        x_spec = pl.BlockSpec((tile_n, d_in_pad), lambda j: (0, 0))   # resident
        w_spec = pl.BlockSpec((tile_f, d_in_pad), lambda j: (j, 0))
        v_spec = pl.BlockSpec((1, tile_f), lambda j: (0, j))
        o_spec = pl.BlockSpec((tile_n, tile_f), lambda j: (0, j))
        dim_sem = ("parallel",)
    else:
        grid = (n_tiles, f_tiles)
        x_spec = pl.BlockSpec((tile_n, d_in_pad), lambda i, j: (i, 0))
        w_spec = pl.BlockSpec((tile_f, d_in_pad), lambda i, j: (j, 0))
        v_spec = pl.BlockSpec((1, tile_f), lambda i, j: (0, j))
        o_spec = pl.BlockSpec((tile_n, tile_f), lambda i, j: (i, j))
        dim_sem = ("parallel", "parallel")

    mm_item = jnp.dtype(matmul_dtype).itemsize
    block_bytes = (tile_n * d_in_pad * mm_item        # x tile
                   + tile_f * d_in_pad * mm_item      # weight tile
                   + 3 * tile_f * 4                   # bias / gamma / beta
                   + tile_n * tile_f * 4)             # output tile
    # Double-buffered pipeline + f32 accumulator + headroom, capped so the
    # request still fits v7x's smaller (64 MiB physical) VMEM.
    vmem_limit = int(min(max(2 * block_bytes + tile_n * tile_f * 4 + (4 << 20),
                             16 << 20),
                         40 << 20))

    cost = pl.CostEstimate(
        flops=2 * n * d_in * d_out + 6 * n * d_out,
        transcendentals=0,
        bytes_accessed=int(x_p.size * mm_item + w_p.size * mm_item
                           + 3 * d_out_pad * 4 + n_pad * d_out_pad * 4),
    )

    out = pl.pallas_call(
        kernel,
        out_shape=jax.ShapeDtypeStruct((n_pad, d_out_pad), jnp.float32),
        grid=grid,
        in_specs=[x_spec, w_spec, v_spec, v_spec, v_spec],
        out_specs=o_spec,
        compiler_params=pltpu.CompilerParams(
            dimension_semantics=dim_sem,
            vmem_limit_bytes=vmem_limit),
        cost_estimate=cost,
    )(x_p, w_p, b_p, g_p, be_p)

    return out[:n, :d_out]


def _reference(x, weight, bias, gamma, beta, batchnorm=True):
    y = x @ weight.T + bias
    if batchnorm:
        mean = jnp.mean(y, axis=0, keepdims=True)
        var = jnp.mean((y - mean) ** 2, axis=0, keepdims=True)
        y = (y - mean) / jnp.sqrt(var + _BN_EPS)
        y = y * gamma + beta
    return jnp.maximum(y, 0.0)


if __name__ == "__main__":
    key = jax.random.PRNGKey(0)

    def _mk(k, n, d_in, d_out):
        kx, kw, kb = jax.random.split(k, 3)
        x = jax.random.normal(kx, (n, d_in), dtype=jnp.float32)
        bound = 1.0 / jnp.sqrt(jnp.float32(d_in))
        w = jax.random.uniform(kw, (d_out, d_in), minval=-bound, maxval=bound,
                               dtype=jnp.float32)
        b = jax.random.uniform(kb, (d_out,), minval=-bound, maxval=bound,
                               dtype=jnp.float32)
        g = jnp.ones((d_out,), jnp.float32)   # BatchNorm1d init
        be = jnp.zeros((d_out,), jnp.float32)
        return x, w, b, g, be

    # 1) small layer, batchnorm on, f32 matmul (tight check)
    x, w, b, g, be = _mk(key, 8, 32, 32)
    out_bn = jax.block_until_ready(nonlin_block(x, w, b, g, be, batchnorm=True))
    ref_bn = _reference(x, w, b, g, be, batchnorm=True)
    assert out_bn.shape == ref_bn.shape
    assert jnp.allclose(out_bn, ref_bn, atol=1e-4, rtol=1e-4), "mismatch (bn)"

    # 2) small layer, batchnorm off
    out_nb = jax.block_until_ready(nonlin_block(x, w, b, g, be, batchnorm=False))
    ref_nb = _reference(x, w, b, g, be, batchnorm=False)
    assert jnp.allclose(out_nb, ref_nb, atol=1e-4, rtol=1e-4), "mismatch (no bn)"

    # 3) wider layer: exercises the feature-tiled grid (1024 -> 2 tiles of 512)
    k3 = jax.random.fold_in(key, 3)
    x3, w3, b3, g3, be3 = _mk(k3, 16, 96, 1024)
    out3 = jax.block_until_ready(nonlin_block(x3, w3, b3, g3, be3, batchnorm=True))
    ref3 = _reference(x3, w3, b3, g3, be3, batchnorm=True)
    assert jnp.allclose(out3, ref3, atol=1e-3, rtol=1e-3), "mismatch (wide bn)"

    # 4) no-batchnorm path with a 2-D (batch x feature) grid
    k4 = jax.random.fold_in(key, 4)
    x4, w4, b4, g4, be4 = _mk(k4, 600, 96, 256)
    out4 = jax.block_until_ready(nonlin_block(x4, w4, b4, g4, be4, batchnorm=False))
    ref4 = _reference(x4, w4, b4, g4, be4, batchnorm=False)
    assert jnp.allclose(out4, ref4, atol=1e-3, rtol=1e-3), "mismatch (2d grid)"

    # 5) bf16 MXU-input path (v6e/v7x fast path); BN/ReLU epilogue stays f32
    out5 = jax.block_until_ready(
        nonlin_block(x, w, b, g, be, batchnorm=True, matmul_dtype=jnp.bfloat16))
    assert bool(jnp.all(jnp.isfinite(out5)))
    assert jnp.allclose(out5, ref_bn, atol=0.2, rtol=0.2), "mismatch (bf16)"

    print("KERNEL_OK")
</pallas_src>

<mosaic_0001>
module attributes {stable_mosaic.version = 11 : i64} {
  func.func @_nonlin_block_kernel(%arg0: i32, %arg1: memref<8x128xf32, #tpu.memory_space<vmem>>, %arg2: memref<128x128xf32, #tpu.memory_space<vmem>>, %arg3: memref<1x128xf32, #tpu.memory_space<vmem>>, %arg4: memref<1x128xf32, #tpu.memory_space<vmem>>, %arg5: memref<1x128xf32, #tpu.memory_space<vmem>>, %arg6: memref<8x128xf32, #tpu.memory_space<vmem>>) attributes {dimension_semantics = [#tpu.dimension_semantics<parallel>], iteration_bounds = array<i64: 1>, scalar_prefetch = 0 : i64, scratch_operands = 0 : i64, tpu.core_type = #tpu.core_type<tc>, window_params = [{pipeline_mode = #tpu.pipeline_mode<synchronous>, transform_indices = @transform_0, window_bounds = array<i64: 8, 128>}, {transform_indices = @transform_1, window_bounds = array<i64: 128, 128>}, {transform_indices = @transform_2, window_bounds = array<i64: 1, 128>}, {transform_indices = @transform_3, window_bounds = array<i64: 1, 128>}, {transform_indices = @transform_4, window_bounds = array<i64: 1, 128>}, {transform_indices = @transform_5, window_bounds = array<i64: 8, 128>}]} {
    %c0 = arith.constant 0 : index
    %c0_0 = arith.constant 0 : index
    %0 = vector.load %arg1[%c0, %c0_0] : memref<8x128xf32, #tpu.memory_space<vmem>>, vector<8x128xf32>
    %c0_1 = arith.constant 0 : index
    %c0_2 = arith.constant 0 : index
    %1 = vector.load %arg2[%c0_1, %c0_2] : memref<128x128xf32, #tpu.memory_space<vmem>>, vector<128x128xf32>
    %cst = arith.constant dense<0.000000e+00> : vector<8x128xf32>
    %2 = tpu.matmul %0, %1, %cst {dimension_numbers = #tpu.dot_dimension_numbers<[1], [1], [0], [0], [0, 0, 1, 0], [], []>} : vector<8x128xf32>, vector<128x128xf32>, vector<8x128xf32> -> vector<8x128xf32>
    %c0_3 = arith.constant 0 : index
    %c0_4 = arith.constant 0 : index
    %3 = vector.load %arg3[%c0_3, %c0_4] : memref<1x128xf32, #tpu.memory_space<vmem>>, vector<1x128xf32>
    %4 = vector.broadcast %3 : vector<1x128xf32> to vector<8x128xf32>
    %5 = arith.addf %2, %4 : vector<8x128xf32>
    %6 = tpu.iota {dimensions = array<i32: 0>} : vector<8x1xi32>
    %c8_i32 = arith.constant 8 : i32
    %7 = vector.broadcast %c8_i32 : i32 to vector<8x1xi32>
    %8 = arith.cmpi slt, %6, %7 : vector<8x1xi32>
    %9 = arith.extui %8 : vector<8x1xi1> to vector<8x1xi32>
    %10 = arith.sitofp %9 : vector<8x1xi32> to vector<8x1xf32>
    %11 = vector.broadcast %10 : vector<8x1xf32> to vector<8x128xf32>
    %12 = arith.mulf %5, %11 : vector<8x128xf32>
    %cst_5 = arith.constant dense<0.000000e+00> : vector<128xf32>
    %13 = vector.multi_reduction <add>, %12, %cst_5 [0] : vector<8x128xf32> to vector<128xf32>
    %14 = vector.shape_cast %13 : vector<128xf32> to vector<1x128xf32>
    %cst_6 = arith.constant 1.250000e-01 : f32
    %15 = vector.broadcast %cst_6 : f32 to vector<1x128xf32>
    %16 = arith.mulf %14, %15 : vector<1x128xf32>
    %17 = vector.broadcast %16 : vector<1x128xf32> to vector<8x128xf32>
    %18 = arith.subf %5, %17 : vector<8x128xf32>
    %19 = vector.broadcast %10 : vector<8x1xf32> to vector<8x128xf32>
    %20 = arith.mulf %18, %19 : vector<8x128xf32>
    %21 = arith.mulf %20, %20 : vector<8x128xf32>
    %cst_7 = arith.constant dense<0.000000e+00> : vector<128xf32>
    %22 = vector.multi_reduction <add>, %21, %cst_7 [0] : vector<8x128xf32> to vector<128xf32>
    %23 = vector.shape_cast %22 : vector<128xf32> to vector<1x128xf32>
    %cst_8 = arith.constant 1.250000e-01 : f32
    %24 = vector.broadcast %cst_8 : f32 to vector<1x128xf32>
    %25 = arith.mulf %23, %24 : vector<1x128xf32>
    %26 = vector.broadcast %16 : vector<1x128xf32> to vector<8x128xf32>
    %27 = arith.subf %5, %26 : vector<8x128xf32>
    %cst_9 = arith.constant 9.99999974E-6 : f32
    %28 = vector.broadcast %cst_9 : f32 to vector<1x128xf32>
    %29 = arith.addf %25, %28 : vector<1x128xf32>
    %30 = math.rsqrt %29 : vector<1x128xf32>
    %31 = vector.broadcast %30 : vector<1x128xf32> to vector<8x128xf32>
    %32 = arith.mulf %27, %31 : vector<8x128xf32>
    %c0_10 = arith.constant 0 : index
    %c0_11 = arith.constant 0 : index
    %33 = vector.load %arg4[%c0_10, %c0_11] : memref<1x128xf32, #tpu.memory_space<vmem>>, vector<1x128xf32>
    %34 = vector.broadcast %33 : vector<1x128xf32> to vector<8x128xf32>
    %35 = arith.mulf %32, %34 : vector<8x128xf32>
    %c0_12 = arith.constant 0 : index
    %c0_13 = arith.constant 0 : index
    %36 = vector.load %arg5[%c0_12, %c0_13] : memref<1x128xf32, #tpu.memory_space<vmem>>, vector<1x128xf32>
    %37 = vector.broadcast %36 : vector<1x128xf32> to vector<8x128xf32>
    %38 = arith.addf %35, %37 : vector<8x128xf32>
    %cst_14 = arith.constant 0.000000e+00 : f32
    %39 = vector.broadcast %cst_14 : f32 to vector<8x128xf32>
    %40 = arith.maximumf %38, %39 : vector<8x128xf32>
    %c0_15 = arith.constant 0 : index
    %c0_16 = arith.constant 0 : index
    %41 = vector.load %arg6[%c0_15, %c0_16] : memref<8x128xf32, #tpu.memory_space<vmem>>, vector<8x128xf32>
    tpu.vector_store %arg6[%c0_15, %c0_16], %40 {strides = array<i32>} : memref<8x128xf32, #tpu.memory_space<vmem>>, vector<8x128xf32>,
    return
  }
  func.func @transform_0(%arg0: i32) -> (i32, i32) {
    %c0_i32 = arith.constant 0 : i32
    %c0_i32_0 = arith.constant 0 : i32
    %c0_i32_1 = arith.constant 0 : i32
    return %c0_i32, %c0_i32_0 : i32, i32
  }
  func.func @transform_1(%arg0: i32) -> (i32, i32) {
    %c0_i32 = arith.constant 0 : i32
    %c0_i32_0 = arith.constant 0 : i32
    return %arg0, %c0_i32 : i32, i32
  }
  func.func @transform_2(%arg0: i32) -> (i32, i32) {
    %c0_i32 = arith.constant 0 : i32
    %c0_i32_0 = arith.constant 0 : i32
    return %c0_i32, %arg0 : i32, i32
  }
  func.func @transform_3(%arg0: i32) -> (i32, i32) {
    %c0_i32 = arith.constant 0 : i32
    %c0_i32_0 = arith.constant 0 : i32
    return %c0_i32, %arg0 : i32, i32
  }
  func.func @transform_4(%arg0: i32) -> (i32, i32) {
    %c0_i32 = arith.constant 0 : i32
    %c0_i32_0 = arith.constant 0 : i32
    return %c0_i32, %arg0 : i32, i32
  }
  func.func @transform_5(%arg0: i32) -> (i32, i32) {
    %c0_i32 = arith.constant 0 : i32
    %c0_i32_0 = arith.constant 0 : i32
    return %c0_i32, %arg0 : i32, i32
  }
}

</mosaic_0001>

<bundles_post_ra>
// kernel: tpu_custom_call.1
= control target key start
LH: loop header
LB: loop body
LE: loop exit
PB: predicated region body
PF: predicated region fallthrough
CT: control target
= control target key end

     0   :  { %10 = vsyncpa [#allocation3], 0  ;;  %s298_s0 = inlined_call_operand.hbm [shape: f32[8,128], index: 0, kind: input, shape index: {}]   ;;  %s299_s1 = inlined_call_operand.hbm [shape: f32[128,128], index: 1, kind: input, shape index: {}]   ;;  %s300_s2 = inlined_call_operand.vmem [shape: f32[1,128], index: 2, kind: input, shape index: {}]   ;;  %s301_s3 = inlined_call_operand.vmem [shape: f32[1,128], index: 3, kind: input, shape index: {}]   ;;  %s302_s4 = inlined_call_operand.vmem [shape: f32[1,128], index: 4, kind: input, shape index: {}]   ;;  %s303_s5 = inlined_call_operand.hbm [shape: f32[8,128], index: 5, kind: output, shape index: {}]  }
   0x1   :  { %11 = vsyncpa [#allocation6], 0 }
   0x2   :  { %12 = vsyncpa [#allocation4], 0  ;;  %s18_s20 = sshll.u32 %s298_s0, 4  ;;  %s245_s21 = smov [#allocation2]   ;;  %s19_s20 = int_to_ptr.hbm [resolvable:$true] %s18_s20 }
   0x3   :  { %s20_s22 = sshll.u32 %s245_s21, 4  ;;  %s28_s25 = sshll.u32 %s299_s1, 4  ;;  %s21_s22 = int_to_ptr.vmem [resolvable:$true] %s20_s22  ;;  %s29_s25 = int_to_ptr.hbm [resolvable:$true] %s28_s25 }
   0x4   :  { %23 = dma.hbm_to_vmem [thread:$0]  %s19_s20, 128, %s21_s22, [#allocation3]  }
   0x5   :  { %s246_s26 = smov [#allocation5]   ;;  %s247_s28 = smov 128  }
   0x6   :  { %s30_s27 = sshll.u32 %s246_s26, 4  ;;  %s248_s29 = smov 8   ;;  %s31_s27 = int_to_ptr.vmem [resolvable:$true] %s30_s27 }
   0x7   :  { %36 = dma.hbm_to_vmem [thread:$0]  %s29_s25, 2048, %s31_s27, [#allocation6], %s247_s28, %s247_s28, %s248_s29  }
   0x8   :  { %239 = dma.done.wait [#allocation3], 128  }
   0x9   :  { %240 = vsyncadd [#allocation3], 4294967168 }
   0xa   :  { %241 = dma.done.wait [#allocation6], 2048  }
   0xb   :  { %242 = vsyncadd [#allocation6], 4294965248  ;;  %v67_v0 = vld [vmem:[#allocation5 + $0x78] sm:$0xff]  ;;  %v66_v1 = vld [vmem:[#allocation5 + $0x70] sm:$0xff]  ;;  %s249_s8 = smov [#allocation7]   ;;  %s146_s12 = sshll.u32 %s303_s5, 4  ;;  %s147_s12 = int_to_ptr.hbm [resolvable:$true] %s146_s12 }
   0xc   :  { %72 = vmatpush.xpose.msra.mxu0 %v67_v0  ;;  %v65_v2 = vld [vmem:[#allocation5 + $0x68] sm:$0xff]  ;;  %v64_v3 = vld [vmem:[#allocation5 + $0x60] sm:$0xff]  ;;  %v63_v4 = vld [vmem:[#allocation5 + $0x58] sm:$0xff]  ;;  %s144_s9 = sshll.u32 %s249_s8, 4  ;;  %s145_s9 = int_to_ptr.vmem [resolvable:$true] %s144_s9 }
   0xd   :  { %v62_v5 = vld [vmem:[#allocation5 + $0x50] sm:$0xff]  ;;  %v61_v6 = vld [vmem:[#allocation5 + $0x48] sm:$0xff]  ;;  %v60_v7 = vld [vmem:[#allocation5 + $0x40] sm:$0xff] }
   0xe   :  { %v59_v8 = vld [vmem:[#allocation5 + $0x38] sm:$0xff]  ;;  %v58_v9 = vld [vmem:[#allocation5 + $0x30] sm:$0xff]  ;;  %v57_v10 = vld [vmem:[#allocation5 + $0x28] sm:$0xff] }
   0xf   :  { %v56_v11 = vld [vmem:[#allocation5 + $0x20] sm:$0xff]  ;;  %v55_v12 = vld [vmem:[#allocation5 + $0x18] sm:$0xff]  ;;  %v54_v13 = vld [vmem:[#allocation5 + $0x10] sm:$0xff] }
  0x10   :  { %73 = vmatpush.xpose.msra.mxu0 %v66_v1  ;;  %v53_v14 = vld [vmem:[#allocation5 + $0x8] sm:$0xff]  ;;  %v52_v15 = vld [vmem:[#allocation5] sm:$0xff]  ;;  %v51_v16 = vld [vmem:[#allocation2] sm:$0xff] }
  0x11   :  { %v162_v17 = vld [vmem:[%s300_s2] ss:$0 sm:$0xff] }
  0x12   :  { %v163_v43 = vld [vmem:[%s301_s3] ss:$0 sm:$0xff] }
  0x13   :  { %v164_v46 = vld [vmem:[%s302_s4] ss:$0 sm:$0xff] }
  0x14   :  { %74 = vmatpush.xpose.msra.mxu0 %v65_v2 }
  0x18   :  { %75 = vmatpush.xpose.msra.mxu0 %v64_v3 }
  0x1c   :  { %76 = vmatpush.xpose.msra.mxu0 %v63_v4 }
  0x20   :  { %77 = vmatpush.xpose.msra.mxu0 %v62_v5 }
  0x24   :  { %78 = vmatpush.xpose.msra.mxu0 %v61_v6 }
  0x28   :  { %79 = vmatpush.xpose.msra.mxu0 %v60_v7 }
  0x2c   :  { %80 = vmatpush.xpose.msra.mxu0 %v59_v8 }
  0x30   :  { %81 = vmatpush.xpose.msra.mxu0 %v58_v9 }
  0x34   :  { %82 = vmatpush.xpose.msra.mxu0 %v57_v10 }
  0x38   :  { %83 = vmatpush.xpose.msra.mxu0 %v56_v11 }
  0x3c   :  { %84 = vmatpush.xpose.msra.mxu0 %v55_v12 }
  0x40   :  { %85 = vmatpush.xpose.msra.mxu0 %v54_v13 }
  0x44   :  { %86 = vmatpush.xpose.msra.mxu0 %v53_v14 }
  0x48   :  { %87 = vmatpush.xpose.msra.mxu0 %v52_v15 }
  0x4b   :  { %88 = vmatmul.f32.vlgmr.msra.gmra.mxu0 %v51_v16 }
  0xc8   :  { %v89_v18 = vpop.f32.mrf.mxu0 }
  0xc9   :  { %v90_v19 = vadd.f32 %v162_v17, %v89_v18 }
  0xcb   :  { %v98_v20 = vrot.slane %v90_v19, 4 }
  0xcd   :  { %v99_v21 = vadd.f32 %v98_v20, %v90_v19 }
  0xcf   :  { %v100_v22 = vrot.slane %v99_v21, 2 }
  0xd1   :  { %v101_v23 = vadd.f32 %v100_v22, %v99_v21 }
  0xd3   :  { %v102_v24 = vrot.slane %v101_v23, 1 }
  0xd5   :  { %v103_v25 = vadd.f32 %v102_v24, %v101_v23 }
  0xd7   :  { %v104_v26 = vmul.f32 0.125, %v103_v25 }
  0xd9   :  { %v105_v27 = vsub.f32 %v90_v19, %v104_v26 }
  0xdb   :  { %v107_v28 = vmul.f32 %v105_v27, %v105_v27 }
  0xdd   :  { %v108_v29 = vrot.slane %v107_v28, 4 }
  0xdf   :  { %v109_v30 = vadd.f32 %v108_v29, %v107_v28 }
  0xe1   :  { %v110_v31 = vrot.slane %v109_v30, 2 }
  0xe3   :  { %v111_v32 = vadd.f32 %v110_v31, %v109_v30 }
  0xe5   :  { %v112_v33 = vrot.slane %v111_v32, 1 }
  0xe7   :  { %v113_v34 = vadd.f32 %v112_v33, %v111_v32 }
  0xe9   :  { %v114_v35 = vmul.f32 0.125, %v113_v34 }
  0xeb   :  { %v115_v36 = vadd.f32 1e-05, %v114_v35 }
  0xed   :  { %165 = vrsqrt.f32 %v115_v36  ;;  %vm122_vm1 = vweird.f32 %v115_v36 }
  0xf3   :  { %v166_v37 = vpop.eup %165 }
  0xf4   :  { %v117_v38 = vmul.f32 %v166_v37, %v115_v36  ;;  %vm123_vm0 = vweird.f32 %v166_v37 }
  0xf5   :  { %vm124_vm2 = vmor %vm122_vm1, %vm123_vm0 }
  0xf6   :  { %v118_v39 = vmul.f32 %v166_v37, %v117_v38 }
  0xf8   :  { %v119_v40 = vmul.f32 0.5, %v118_v39 }
  0xfa   :  { %v120_v41 = vsub.f32 1.5, %v119_v40 }
  0xfc   :  { %v121_v42 = vmul.f32 %v166_v37, %v120_v41 }
  0xfe   :  { %v125_v44 = vsel %vm124_vm2, %v166_v37, %v121_v42 }
  0xff   :  { %v126_v45 = vmul.f32 %v125_v44, %v105_v27 }
 0x101   :  { %v131_v47 = vmul.f32 %v163_v43, %v126_v45 }
 0x103   :  { %v136_v48 = vadd.f32 %v164_v46, %v131_v47 }
 0x105   :  { %v137_v49 = vmax.f32 %v136_v48, 0.0 }
 0x107   :  { %138 = vst [vmem:[#allocation7] sm:$0xff] %v137_v49 }
 0x108   :  { %149 = dma.vmem_to_hbm [thread:$0]  %s145_s9, 128, %s147_s12, [#allocation4]  }
 0x109   :  { %243 = dma.done.wait [#allocation4], 128  }
 0x10a   :  { %244 = vsyncadd [#allocation4], 4294967168 }
 0x10b   :  { %154 = vsyncpa [#allocation3], 1 }
 0x10c   :  { %155 = vsyncpa [#allocation6], 1 }
 0x10d   :  { %156 = vsyncpa [#allocation4], 1 }

</bundles_post_ra>
